<compile_context>
chip_gen: v5e
topology: v5e:2x2
jax: 0.10.0
libtpu: 0.0.40
codegen_flags: <defaults>
</compile_context>

<pallas_src>
import functools

import jax
import jax.numpy as jnp
from jax.experimental import pallas as pl
from jax.experimental.pallas import tpu as pltpu

_EPS = 1e-6  # matches torch F.pairwise_distance default eps (added to the diff)


def _round_up(x, m):
    return ((x + m - 1) // m) * m


def _tpu_flavor():
    """Best-effort chip query: (vmem_capacity_bytes, is_v7x, has_bf16_valu)."""
    vmem_bytes = 128 << 20
    kind = ""
    try:
        vmem_bytes = int(pltpu.get_tpu_info().vmem_capacity_bytes)
    except Exception:
        pass
    try:
        kind = jax.devices()[0].device_kind.lower()
    except Exception:
        pass
    is_v7x = ("v7" in kind) or ("tpu7" in kind)
    # bf16 VALU exists on v6e / v7x; v2-v5 must widen to f32 before the subtract.
    has_bf16_valu = bool(kind) and not any(g in kind for g in ("v2", "v3", "v4", "v5"))
    return vmem_bytes, is_v7x, has_bf16_valu


def _choose_tiles(batch, feat, itemsize, *, input_budget, is_v7x, sublane_pack):
    # Feature tile: full D when small (lane dim == full array dim is always legal),
    # otherwise a 2048-wide multiple of 128 so large D is streamed in chunks.
    block_d = feat if feat <= 2048 else 2048
    # 2 inputs x 2 pipeline buffers x block_b x block_d x itemsize <= input_budget.
    max_rows = max(sublane_pack,
                   (input_budget // (4 * block_d * itemsize))
                   // sublane_pack * sublane_pack)
    block_b = min(_round_up(batch, sublane_pack), max_rows)
    if is_v7x and batch > sublane_pack:
        # Keep >= 2 batch tiles so the "parallel" axis feeds both TensorCores.
        half = _round_up((batch + 1) // 2, sublane_pack)
        block_b = min(block_b, half)
    return block_b, block_d


def _contrastive_loss_kernel(x1_ref, x2_ref, lab_ref, out_ref, acc_ref, *,
                             margin, batch, feat, block_b, block_d, native_sub):
    i = pl.program_id(0)           # batch tile   ("parallel")
    k = pl.program_id(1)           # feature tile ("arbitrary", reduction axis)
    nk = pl.num_programs(1)
    acc_w = acc_ref.shape[-1]

    @pl.when(k == 0)
    def _():
        acc_ref[...] = jnp.zeros_like(acc_ref)

    def make_diff():
        if native_sub:
            # bf16 subtract on the VPU (v6e/v7x), then one widening cast.
            return (x1_ref[...] - x2_ref[...]).astype(jnp.float32) + _EPS
        # f32 path (v5e has no bf16 VALU; also the no-op path for f32 inputs).
        return (x1_ref[...].astype(jnp.float32)
                - x2_ref[...].astype(jnp.float32)) + _EPS

    def accumulate(diff):
        sq = diff * diff
        if acc_w == 128:
            # Lane-dense accumulate: lane-aligned VALU adds over 128-wide groups.
            # The single cross-lane (XLU) reduce happens once, in the epilogue.
            partial = sq[:, 0:128]
            for g in range(1, block_d // 128):
                partial = partial + sq[:, g * 128:(g + 1) * 128]
            acc_ref[...] += partial
        else:
            acc_ref[...] += jnp.sum(sq, axis=-1, keepdims=True)

    @pl.when(k < nk - 1)
    def _():
        # Hot path: no remainder masking (only the last feature tile can be ragged).
        accumulate(make_diff())

    @pl.when(k == nk - 1)
    def _():
        diff = make_diff()
        if feat % block_d != 0:
            # Mask padded feature columns of the last feature tile only.
            col = jax.lax.broadcasted_iota(jnp.int32, (block_b, block_d), 1)
            diff = jnp.where(col + k * block_d < feat, diff, 0.0)
        accumulate(diff)

        # Epilogue: runs once per batch tile.
        d2 = jnp.sum(acc_ref[...], axis=-1, keepdims=True)        # (block_b, 1)
        dist = jnp.sqrt(d2)
        lab = lab_ref[...].astype(jnp.float32)                    # (block_b, 1)
        hinge = jnp.maximum(margin - dist, 0.0)
        # Positive term uses d2 directly (== dist**2, avoids sqrt->square round-trip).
        per_sample = lab * d2 + (1.0 - lab) * (hinge * hinge)
        if batch % block_b != 0:
            # Mask padded batch rows of the last batch tile (select, not multiply,
            # so NaN/Inf garbage in padded VMEM rows is safe).
            row = jax.lax.broadcasted_iota(jnp.int32, (block_b, 1), 0)
            per_sample = jnp.where(row + i * block_b < batch, per_sample, 0.0)
        tile_sum = jnp.sum(per_sample)
        # Lane/sublane-dense (8,128) output tile: tile_sum at [0,0], zeros elsewhere,
        # so the wrapper reduces with a single exact jnp.sum (no strided gather).
        r8 = jax.lax.broadcasted_iota(jnp.int32, (8, 128), 0)
        c128 = jax.lax.broadcasted_iota(jnp.int32, (8, 128), 1)
        out_ref[...] = jnp.where((r8 == 0) & (c128 == 0), tile_sum, 0.0)


def contrastive_loss(output1, output2, labels, margin=1.0, *,
                     block_b=None, block_d=None):
    """output1/output2: (B, D) float (f32 or bf16); labels: (B,) of {0, 1}."""
    batch, feat = output1.shape
    itemsize = jnp.dtype(output1.dtype).itemsize
    sublane_pack = max(8, 32 // max(itemsize, 1))   # 8 f32, 16 bf16, 32 int8/fp8

    vmem_bytes, is_v7x, has_bf16_valu = _tpu_flavor()
    # Double-buffered input budget: generous on v5e/v6e (128 MiB physical VMEM),
    # conservative on v7x (64 MiB physical per TensorCore).
    if is_v7x:
        input_budget = 24 << 20
    else:
        input_budget = min(40 << 20, max(vmem_bytes // 3, 16 << 20))

    auto_b, auto_d = _choose_tiles(batch, feat, itemsize,
                                   input_budget=input_budget,
                                   is_v7x=is_v7x, sublane_pack=sublane_pack)
    block_b = auto_b if block_b is None else block_b
    block_d = auto_d if block_d is None else block_d

    nb = pl.cdiv(batch, block_b)
    nd = pl.cdiv(feat, block_d)
    acc_w = 128 if block_d % 128 == 0 else 1

    native_sub = bool(has_bf16_valu and output1.dtype == jnp.bfloat16)

    labels_col = labels.reshape(batch, 1)   # keep native dtype; cast in-kernel

    kernel = functools.partial(
        _contrastive_loss_kernel, margin=float(margin),
        batch=batch, feat=feat, block_b=block_b, block_d=block_d,
        native_sub=native_sub)

    lab_itemsize = jnp.dtype(labels_col.dtype).itemsize
    vmem_needed = (4 * block_b * block_d * itemsize      # 2 inputs x 2 buffers
                   + 2 * block_b * lab_itemsize          # labels column (2 buffers)
                   + 2 * 8 * 128 * 4                     # output tile (2 buffers)
                   + block_b * acc_w * 4                 # accumulator scratch
                   + (4 << 20))                          # compiler headroom
    vmem_cap = (48 << 20) if is_v7x else (100 << 20)
    vmem_limit = int(min(max(vmem_needed, 32 << 20), vmem_cap))

    partials = pl.pallas_call(
        kernel,
        out_shape=jax.ShapeDtypeStruct((nb * 8, 128), jnp.float32),
        grid_spec=pltpu.PrefetchScalarGridSpec(
            num_scalar_prefetch=0,
            grid=(nb, nd),
            in_specs=[
                pl.BlockSpec((block_b, block_d), lambda i, k: (i, k)),  # output1
                pl.BlockSpec((block_b, block_d), lambda i, k: (i, k)),  # output2
                pl.BlockSpec((block_b, 1), lambda i, k: (i, 0)),        # labels col
            ],
            out_specs=pl.BlockSpec((8, 128), lambda i, k: (i, 0)),      # tile partial sums
            scratch_shapes=[pltpu.VMEM((block_b, acc_w), jnp.float32)], # d2 accumulator
        ),
        compiler_params=pltpu.CompilerParams(
            dimension_semantics=("parallel", "arbitrary"),
            vmem_limit_bytes=vmem_limit,
        ),
    )(output1, output2, labels_col)

    # Every (8,128) tile holds its partial sum at [0,0] and zeros elsewhere ->
    # single exact reduction; divide by the TRUE batch size (padded rows masked).
    return jnp.sum(partials) / batch


def _reference_loss(output1, output2, labels, margin=1.0):
    # Pure-JAX reference mirroring the PyTorch forward (f32 math).
    x1 = output1.astype(jnp.float32)
    x2 = output2.astype(jnp.float32)
    lab = labels.astype(jnp.float32)
    diff = x1 - x2 + _EPS
    dist = jnp.sqrt(jnp.sum(diff * diff, axis=-1))
    loss = lab * dist ** 2 + (1.0 - lab) * jnp.maximum(margin - dist, 0.0) ** 2
    return loss.mean()


if __name__ == "__main__":
    key = jax.random.PRNGKey(0)
    k1, k2, k3, k4, k5, k6 = jax.random.split(key, 6)

    # Case 1: small shapes consistent with the module (single tile, f32).
    B, D = 8, 32
    o1 = jax.random.normal(k1, (B, D), dtype=jnp.float32)
    o2 = jax.random.normal(k2, (B, D), dtype=jnp.float32)
    lab = jax.random.bernoulli(k3, 0.5, (B,)).astype(jnp.float32)
    loss = contrastive_loss(o1, o2, lab, margin=1.0)
    jax.block_until_ready(loss)
    ref = _reference_loss(o1, o2, lab, margin=1.0)
    assert jnp.allclose(loss, ref, atol=1e-5, rtol=1e-5), (loss, ref)

    # Case 2: bf16 inputs with ragged tiles — exercises the 2-D grid, the hot/last
    # feature-tile split, the lane-dense accumulator, the in-kernel widening cast
    # (or bf16-native subtract on v6e/v7x), and row/column remainder masking.
    B2, D2 = 60, 200
    p1 = jax.random.normal(k4, (B2, D2), dtype=jnp.bfloat16)
    p2 = jax.random.normal(k5, (B2, D2), dtype=jnp.bfloat16)
    lab2 = jax.random.bernoulli(k6, 0.5, (B2,)).astype(jnp.float32)
    loss2 = contrastive_loss(p1, p2, lab2, margin=1.0, block_b=16, block_d=128)
    jax.block_until_ready(loss2)
    ref2 = _reference_loss(p1, p2, lab2, margin=1.0)
    # Tolerance covers both the bf16-native-sub (v6e/v7x) and f32-widen (v5e) paths
    # vs. the f32 reference.
    assert jnp.allclose(loss2, ref2, atol=0.5, rtol=1e-2), (loss2, ref2)

    print("KERNEL_OK")
</pallas_src>

<mosaic_0001>
module attributes {stable_mosaic.version = 11 : i64} {
  func.func @_contrastive_loss_kernel(%arg0: i32, %arg1: i32, %arg2: memref<8x32xf32, #tpu.memory_space<vmem>>, %arg3: memref<8x32xf32, #tpu.memory_space<vmem>>, %arg4: memref<8x1xf32, #tpu.memory_space<vmem>>, %arg5: memref<8x128xf32, #tpu.memory_space<vmem>>, %arg6: memref<8x1xf32, #tpu.memory_space<vmem>>) attributes {dimension_semantics = [#tpu.dimension_semantics<parallel>, #tpu.dimension_semantics<arbitrary>], iteration_bounds = array<i64: 1, 1>, scalar_prefetch = 0 : i64, scratch_operands = 1 : i64, tpu.core_type = #tpu.core_type<tc>, window_params = [{transform_indices = @transform_0, window_bounds = array<i64: 8, 32>}, {transform_indices = @transform_1, window_bounds = array<i64: 8, 32>}, {transform_indices = @transform_2, window_bounds = array<i64: 8, 1>}, {transform_indices = @transform_3, window_bounds = array<i64: 8, 128>}]} {
    %c0_i32 = arith.constant 0 : i32
    %0 = arith.cmpi eq, %arg1, %c0_i32 : i32
    %1 = arith.extui %0 : i1 to i32
    %c0_i32_0 = arith.constant 0 : i32
    %2 = arith.cmpi ne, %1, %c0_i32_0 : i32
    scf.if %2 {
      %cst = arith.constant 0.000000e+00 : f32
      %9 = vector.broadcast %cst : f32 to vector<8x1xf32>
      %c0 = arith.constant 0 : index
      %c0_5 = arith.constant 0 : index
      %10 = vector.load %arg6[%c0, %c0_5] : memref<8x1xf32, #tpu.memory_space<vmem>>, vector<8x1xf32>
      tpu.vector_store %arg6[%c0, %c0_5], %9 {strides = array<i32>} : memref<8x1xf32, #tpu.memory_space<vmem>>, vector<8x1xf32>,
    } else {
    }
    %c0_i32_1 = arith.constant 0 : i32
    %3 = arith.cmpi slt, %arg1, %c0_i32_1 : i32
    %4 = arith.extui %3 : i1 to i32
    %c0_i32_2 = arith.constant 0 : i32
    %5 = arith.cmpi ne, %4, %c0_i32_2 : i32
    scf.if %5 {
      %c0 = arith.constant 0 : index
      %c0_5 = arith.constant 0 : index
      %9 = vector.load %arg2[%c0, %c0_5] : memref<8x32xf32, #tpu.memory_space<vmem>>, vector<8x32xf32>
      %c0_6 = arith.constant 0 : index
      %c0_7 = arith.constant 0 : index
      %10 = vector.load %arg3[%c0_6, %c0_7] : memref<8x32xf32, #tpu.memory_space<vmem>>, vector<8x32xf32>
      %11 = arith.subf %9, %10 : vector<8x32xf32>
      %cst = arith.constant 9.99999997E-7 : f32
      %12 = vector.broadcast %cst : f32 to vector<8x32xf32>
      %13 = arith.addf %11, %12 : vector<8x32xf32>
      %14 = arith.mulf %13, %13 : vector<8x32xf32>
      %c0_8 = arith.constant 0 : index
      %c0_9 = arith.constant 0 : index
      %15 = vector.load %arg6[%c0_8, %c0_9] : memref<8x1xf32, #tpu.memory_space<vmem>>, vector<8x1xf32>
      %cst_10 = arith.constant dense<0.000000e+00> : vector<8xf32>
      %16 = vector.multi_reduction <add>, %14, %cst_10 [1] : vector<8x32xf32> to vector<8xf32>
      %17 = vector.shape_cast %16 : vector<8xf32> to vector<8x1xf32>
      %18 = arith.addf %15, %17 : vector<8x1xf32>
      %c0_11 = arith.constant 0 : index
      %c0_12 = arith.constant 0 : index
      %19 = vector.load %arg6[%c0_11, %c0_12] : memref<8x1xf32, #tpu.memory_space<vmem>>, vector<8x1xf32>
      tpu.vector_store %arg6[%c0_11, %c0_12], %18 {strides = array<i32>} : memref<8x1xf32, #tpu.memory_space<vmem>>, vector<8x1xf32>,
    } else {
    }
    %c0_i32_3 = arith.constant 0 : i32
    %6 = arith.cmpi eq, %arg1, %c0_i32_3 : i32
    %7 = arith.extui %6 : i1 to i32
    %c0_i32_4 = arith.constant 0 : i32
    %8 = arith.cmpi ne, %7, %c0_i32_4 : i32
    scf.if %8 {
      %c0 = arith.constant 0 : index
      %c0_5 = arith.constant 0 : index
      %9 = vector.load %arg2[%c0, %c0_5] : memref<8x32xf32, #tpu.memory_space<vmem>>, vector<8x32xf32>
      %c0_6 = arith.constant 0 : index
      %c0_7 = arith.constant 0 : index
      %10 = vector.load %arg3[%c0_6, %c0_7] : memref<8x32xf32, #tpu.memory_space<vmem>>, vector<8x32xf32>
      %11 = arith.subf %9, %10 : vector<8x32xf32>
      %cst = arith.constant 9.99999997E-7 : f32
      %12 = vector.broadcast %cst : f32 to vector<8x32xf32>
      %13 = arith.addf %11, %12 : vector<8x32xf32>
      %14 = arith.mulf %13, %13 : vector<8x32xf32>
      %c0_8 = arith.constant 0 : index
      %c0_9 = arith.constant 0 : index
      %15 = vector.load %arg6[%c0_8, %c0_9] : memref<8x1xf32, #tpu.memory_space<vmem>>, vector<8x1xf32>
      %cst_10 = arith.constant dense<0.000000e+00> : vector<8xf32>
      %16 = vector.multi_reduction <add>, %14, %cst_10 [1] : vector<8x32xf32> to vector<8xf32>
      %17 = vector.shape_cast %16 : vector<8xf32> to vector<8x1xf32>
      %18 = arith.addf %15, %17 : vector<8x1xf32>
      %c0_11 = arith.constant 0 : index
      %c0_12 = arith.constant 0 : index
      %19 = vector.load %arg6[%c0_11, %c0_12] : memref<8x1xf32, #tpu.memory_space<vmem>>, vector<8x1xf32>
      tpu.vector_store %arg6[%c0_11, %c0_12], %18 {strides = array<i32>} : memref<8x1xf32, #tpu.memory_space<vmem>>, vector<8x1xf32>,
      %c0_13 = arith.constant 0 : index
      %c0_14 = arith.constant 0 : index
      %20 = vector.load %arg6[%c0_13, %c0_14] : memref<8x1xf32, #tpu.memory_space<vmem>>, vector<8x1xf32>
      %cst_15 = arith.constant dense<0.000000e+00> : vector<8xf32>
      %21 = vector.multi_reduction <add>, %20, %cst_15 [1] : vector<8x1xf32> to vector<8xf32>
      %22 = vector.shape_cast %21 : vector<8xf32> to vector<8x1xf32>
      %23 = math.sqrt %22 : vector<8x1xf32>
      %c0_16 = arith.constant 0 : index
      %c0_17 = arith.constant 0 : index
      %24 = vector.load %arg4[%c0_16, %c0_17] : memref<8x1xf32, #tpu.memory_space<vmem>>, vector<8x1xf32>
      %cst_18 = arith.constant 1.000000e+00 : f32
      %25 = vector.broadcast %cst_18 : f32 to vector<8x1xf32>
      %26 = arith.subf %25, %23 : vector<8x1xf32>
      %cst_19 = arith.constant 0.000000e+00 : f32
      %27 = vector.broadcast %cst_19 : f32 to vector<8x1xf32>
      %28 = arith.maximumf %26, %27 : vector<8x1xf32>
      %29 = arith.mulf %24, %22 : vector<8x1xf32>
      %cst_20 = arith.constant 1.000000e+00 : f32
      %30 = vector.broadcast %cst_20 : f32 to vector<8x1xf32>
      %31 = arith.subf %30, %24 : vector<8x1xf32>
      %32 = arith.mulf %28, %28 : vector<8x1xf32>
      %33 = arith.mulf %31, %32 : vector<8x1xf32>
      %34 = arith.addf %29, %33 : vector<8x1xf32>
      %35 = vector.shape_cast %34 : vector<8x1xf32> to vector<1x8x1xf32>
      %cst_21 = arith.constant dense<0.000000e+00> : vector<1xf32>
      %36 = vector.multi_reduction <add>, %35, %cst_21 [1, 2] : vector<1x8x1xf32> to vector<1xf32>
      %37 = vector.shape_cast %36 : vector<1xf32> to vector<1x1x1xf32>
      %38 = vector.extract %37[0, 0, 0] : f32 from vector<1x1x1xf32>
      %39 = tpu.iota {dimensions = array<i32: 0>} : vector<8x128xi32>
      %40 = tpu.iota {dimensions = array<i32: 1>} : vector<8x128xi32>
      %c0_i32_22 = arith.constant 0 : i32
      %41 = vector.broadcast %c0_i32_22 : i32 to vector<8x128xi32>
      %42 = arith.cmpi eq, %39, %41 : vector<8x128xi32>
      %c0_i32_23 = arith.constant 0 : i32
      %43 = vector.broadcast %c0_i32_23 : i32 to vector<8x128xi32>
      %44 = arith.cmpi eq, %40, %43 : vector<8x128xi32>
      %45 = arith.andi %42, %44 : vector<8x128xi1>
      %cst_24 = arith.constant 0.000000e+00 : f32
      %46 = vector.broadcast %38 : f32 to vector<8x128xf32>
      %47 = vector.broadcast %cst_24 : f32 to vector<8x128xf32>
      %48 = arith.select %45, %46, %47 : vector<8x128xi1>, vector<8x128xf32>
      %c0_25 = arith.constant 0 : index
      %c0_26 = arith.constant 0 : index
      %49 = vector.load %arg5[%c0_25, %c0_26] : memref<8x128xf32, #tpu.memory_space<vmem>>, vector<8x128xf32>
      tpu.vector_store %arg5[%c0_25, %c0_26], %48 {strides = array<i32>} : memref<8x128xf32, #tpu.memory_space<vmem>>, vector<8x128xf32>,
    } else {
    }
    return
  }
  func.func @transform_0(%arg0: i32, %arg1: i32) -> (i32, i32) {
    %c0_i32 = arith.constant 0 : i32
    return %arg0, %arg1 : i32, i32
  }
  func.func @transform_1(%arg0: i32, %arg1: i32) -> (i32, i32) {
    %c0_i32 = arith.constant 0 : i32
    return %arg0, %arg1 : i32, i32
  }
  func.func @transform_2(%arg0: i32, %arg1: i32) -> (i32, i32) {
    %c0_i32 = arith.constant 0 : i32
    %c0_i32_0 = arith.constant 0 : i32
    return %arg0, %c0_i32 : i32, i32
  }
  func.func @transform_3(%arg0: i32, %arg1: i32) -> (i32, i32) {
    %c0_i32 = arith.constant 0 : i32
    %c0_i32_0 = arith.constant 0 : i32
    return %arg0, %c0_i32 : i32, i32
  }
}

</mosaic_0001>

<bundles_post_ra>
// kernel: tpu_custom_call.1
= control target key start
LH: loop header
LB: loop body
LE: loop exit
PB: predicated region body
PF: predicated region fallthrough
CT: control target
= control target key end

     0   :  { %8 = vsyncpa [#allocation4], 0  ;;  %s224_s0 = inlined_call_operand.vmem [shape: f32[8,32], index: 0, kind: input, shape index: {}]   ;;  %s225_s1 = inlined_call_operand.hbm [shape: f32[8,32], index: 1, kind: input, shape index: {}]   ;;  %s226_s2 = inlined_call_operand.vmem [shape: f32[8,1], index: 2, kind: input, shape index: {}]   ;;  %s227_s3 = inlined_call_operand.hbm [shape: f32[8,128], index: 3, kind: output, shape index: {}]  }
   0x1   :  { %9 = vsyncpa [#allocation5], 0  ;;  %s17_s14 = sshll.u32 %s225_s1, 4  ;;  %s186_s15 = smov [#allocation3]   ;;  %s18_s14 = int_to_ptr.hbm [resolvable:$true] %s17_s14 }
   0x2   :  { %s19_s16 = sshll.u32 %s186_s15, 4  ;;  %s20_s16 = int_to_ptr.vmem [resolvable:$true] %s19_s16 }
   0x3   :  { %22 = dma.hbm_to_vmem [thread:$0]  %s18_s14, 128, %s20_s16, [#allocation4]  }
   0x4   :  { %182 = dma.done.wait [#allocation4], 128  }
   0x5   :  { %183 = vsyncadd [#allocation4], 4294967168  ;;  %vm33_vm0 = vcmask 7168   ;;  %v187_v0 = vmov 0.0   ;;  %v55_v1 = vld [vmem:[%s224_s0] sm:$0xff]  ;;  %v56_v2 = vld [vmem:[#allocation3] sm:$0xff]  ;;  %v100_v37 = vlaneseq }
   0x6   :  { %34 = vst.msk [vmem:[#allocation2] sm:$0xff] %vm33_vm0, %v187_v0  ;;  %v57_v3 = vsub.f32 %v55_v1, %v56_v2  ;;  %vm61_vm1 = vcmask 261120   ;;  %v82_v22 = vld [vmem:[%s226_s2] sm:$0xff]  ;;  %s188_s2 = smov [#allocation6]   ;;  %s117_s22 = sshll.u32 %s227_s3, 4  ;;  %s118_s22 = int_to_ptr.hbm [resolvable:$true] %s117_s22 }
   0x7   :  { %v86_v24 = vsub.f32 1.0, %v82_v22  ;;  %v101_v38 = vshrl.u32 %v100_v37, 7  ;;  %v103_v39 = vand.u32 127, %v100_v37  ;;  %s115_s19 = sshll.u32 %s188_s2, 4  ;;  %s116_s19 = int_to_ptr.vmem [resolvable:$true] %s115_s19 }
   0x8   :  { %v58_v4 = vadd.f32 1e-06, %v57_v3 }
   0x9   :  { %vm104_vm4 = vcmp.eq.s32.totalorder %v101_v38, 0  ;;  %vm105_vm5 = vcmp.eq.s32.totalorder %v103_v39, 0 }
   0xa   :  { %v59_v5 = vmul.f32 %v58_v4, %v58_v4  ;;  %vm106_vm6 = vmand %vm104_vm4, %vm105_vm5 }
   0xc   :  { %v62_v6 = vsel %vm61_vm1, %v59_v5, 0.0 }
   0xd   :  { %63 = vadd.xlane.f32.xlu0 %v62_v6  ;;  %v60_v7 = vld [vmem:[#allocation2] sm:$0xff] }
  0x80   :  { %v64_v8 = vpop.xlane.xlu0 %63 }
  0x81   :  { %v65_v9 = vadd.f32 %v64_v8, %v60_v7 }
  0x83   :  { %67 = vst.msk [vmem:[#allocation2] sm:$0xff] %vm33_vm0, %v65_v9 }
  0x8a   :  { %v68_v10 = vld [vmem:[#allocation2] sm:$0xff] }
  0x8b   :  { %132 = vrsqrt.f32 %v68_v10  ;;  %vm77_vm2 = vcmp.eq.f32.partialorder %v68_v10, inf  ;;  %v80_v18 = vand.u32 2147483648, %v68_v10  ;;  %vm79_vm3 = vcmp.eq.f32.partialorder %v68_v10, 0.0 }
  0x8c   :  { %v85_v26 = vmul.f32 %v82_v22, %v68_v10 }
  0x91   :  { %v133_v11 = vpop.eup %132 }
  0x92   :  { %v71_v12 = vmul.f32 %v133_v11, %v68_v10 }
  0x94   :  { %v72_v13 = vmul.f32 %v133_v11, %v71_v12 }
  0x96   :  { %v73_v14 = vmul.f32 0.5, %v72_v13 }
  0x98   :  { %v74_v15 = vsub.f32 1.5, %v73_v14 }
  0x9a   :  { %v75_v16 = vmul.f32 %v133_v11, %v74_v15 }
  0x9c   :  { %v76_v17 = vmul.f32 %v75_v16, %v68_v10 }
  0x9e   :  { %v78_v19 = vsel %vm77_vm2, %v68_v10, %v76_v17 }
  0x9f   :  { %v81_v20 = vsel %vm79_vm3, %v80_v18, %v78_v19 }
  0xa0   :  { %v83_v21 = vsub.f32 1.0, %v81_v20 }
  0xa2   :  { %v84_v23 = vmax.f32 %v83_v21, 0.0 }
  0xa4   :  { %v87_v25 = vmul.f32 %v84_v23, %v84_v23 }
  0xa6   :  { %v88_v27 = vmul.f32 %v87_v25, %v86_v24 }
  0xa8   :  { %v89_v28 = vadd.f32 %v88_v27, %v85_v26 }
  0xaa   :  { %v90_v29 = vsel %vm33_vm0, %v89_v28, 0.0 }
  0xab   :  { %91 = vadd.xlane.f32.xlu0 %v90_v29 }
 0x11e   :  { %v92_v30 = vpop.xlane.xlu0 %91 }
 0x11f   :  { %v93_v31 = vrot.slane %v92_v30, 4 }
 0x121   :  { %v94_v32 = vadd.f32 %v93_v31, %v92_v30 }
 0x123   :  { %v95_v33 = vrot.slane %v94_v32, 2 }
 0x125   :  { %v96_v34 = vadd.f32 %v95_v33, %v94_v32 }
 0x127   :  { %v97_v35 = vrot.slane %v96_v34, 1 }
 0x129   :  { %v98_v36 = vadd.f32 %v97_v35, %v96_v34 }
 0x12b   :  { %127 = vpush %v98_v36 }
 0x15c   :  { %s128_s23 = spop %127 }
 0x15d   :  { %v107_v40 = vstv %s128_s23 }
 0x15e   :  { %v108_v41 = vsel %vm106_vm6, %v107_v40, 0.0 }
 0x15f   :  { %109 = vst [vmem:[#allocation6] sm:$0xff] %v108_v41 }
 0x160   :  { %120 = dma.vmem_to_hbm [thread:$0]  %s116_s19, 128, %s118_s22, [#allocation5]  }
 0x161   :  { %184 = dma.done.wait [#allocation5], 128  }
 0x162   :  { %185 = vsyncadd [#allocation5], 4294967168 }
 0x163   :  { %125 = vsyncpa [#allocation4], 1 }
 0x164   :  { %126 = vsyncpa [#allocation5], 1 }

</bundles_post_ra>
